<compile_context>
chip_gen: v6e
topology: v6e:2x2x1
jax: 0.10.0
libtpu: 0.0.40
codegen_flags: <defaults>
</compile_context>

<pallas_src>
import jax
import jax.numpy as jnp
from jax.experimental import pallas as pl
from jax.experimental.pallas import tpu as pltpu


def _mlp_kernel(x_ref, w1_ref, b1_ref, w2_ref, b2_ref, out_ref):
    x = x_ref[...]          # (B, F) f32
    w1 = w1_ref[...]        # (F, H)
    b1 = b1_ref[...]        # (1, H)
    w2 = w2_ref[...]        # (H, C)
    b2 = b2_ref[...]        # (1, C)

    B, F = x.shape
    H = w1.shape[1]
    C = w2.shape[1]

    # ---- Layer 1: h = relu(x @ W1 + b1), unrolled as F broadcast MACs (VPU) ----
    # Accumulator is seeded with the bias (fused bias add), kept in f32.
    h = jnp.broadcast_to(b1, (B, H))
    for f in range(F):                       # F = 4, fully unrolled at trace time
        h = h + x[:, f:f + 1] * w1[f:f + 1, :]
    h = jnp.maximum(h, 0.0)

    # ---- Layer 2: y = h @ W2 + b2, unrolled as H broadcast MACs (VPU) ----
    y = jnp.broadcast_to(b2, (B, C))
    for k in range(H):                       # H = 8, fully unrolled
        y = y + h[:, k:k + 1] * w2[k:k + 1, :]

    out_ref[...] = y.astype(out_ref.dtype)


def prepare_params(w1, b1, w2, b2):
    """One-time parameter prep (hoisted out of the forward call):
    weights stay (in, out); biases become (1, out) rows; everything f32."""
    H = w1.shape[1]
    C = w2.shape[1]
    return (w1.astype(jnp.float32),
            b1.reshape(1, H).astype(jnp.float32),
            w2.astype(jnp.float32),
            b2.reshape(1, C).astype(jnp.float32))


@jax.jit
def penguin_classifier_forward(x, w1, b1_row, w2, b2_row):
    """x: (B, F) f32; w1: (F, H); b1_row: (1, H); w2: (H, C); b2_row: (1, C)."""
    B = x.shape[0]
    C = w2.shape[1]
    vmem = pl.BlockSpec(memory_space=pltpu.MemorySpace.VMEM)
    # Grid-less call: the whole problem fits trivially in VMEM, so there is no
    # grid, no index maps, and no double-buffering overhead.
    # TODO(synk): if batch becomes large, reintroduce a batch-tiled grid
    # (tile a multiple of 8 sublanes, "parallel" semantics to use both v7x TCs).
    return pl.pallas_call(
        _mlp_kernel,
        out_shape=jax.ShapeDtypeStruct((B, C), jnp.float32),
        in_specs=[vmem, vmem, vmem, vmem, vmem],
        out_specs=vmem,
    )(x, w1, b1_row, w2, b2_row)


if __name__ == "__main__":
    # Small shapes implied by the module: n_features=4, hidden=8, n_classes=3.
    batch, n_features, hidden, n_classes = 8, 4, 8, 3

    key = jax.random.PRNGKey(0)
    kx, kw1, kw2 = jax.random.split(key, 3)

    x = jax.random.normal(kx, (batch, n_features), dtype=jnp.float32)

    # PyTorch Linear weight is (out, in); we store the transpose (in, out).
    w1 = jax.random.normal(kw1, (n_features, hidden), dtype=jnp.float32) * 0.1
    b1 = jnp.zeros((hidden,), dtype=jnp.float32)
    w2 = jax.random.normal(kw2, (hidden, n_classes), dtype=jnp.float32) * 0.1
    b2 = jnp.zeros((n_classes,), dtype=jnp.float32)

    params = prepare_params(w1, b1, w2, b2)

    out = penguin_classifier_forward(x, *params)
    out = jax.block_until_ready(out)

    # Reference check in plain JAX (same math as the PyTorch forward).
    ref = jnp.maximum(x @ w1 + b1, 0.0) @ w2 + b2
    assert out.shape == (batch, n_classes)
    assert jnp.allclose(out, ref, atol=1e-5, rtol=1e-5)

    print("KERNEL_OK")
</pallas_src>

<mosaic_0001>
module attributes {stable_mosaic.version = 11 : i64} {
  func.func @_mlp_kernel(%arg0: memref<8x4xf32, #tpu.memory_space<vmem>>, %arg1: memref<4x8xf32, #tpu.memory_space<vmem>>, %arg2: memref<1x8xf32, #tpu.memory_space<vmem>>, %arg3: memref<8x3xf32, #tpu.memory_space<vmem>>, %arg4: memref<1x3xf32, #tpu.memory_space<vmem>>, %arg5: memref<8x3xf32, #tpu.memory_space<vmem>>) attributes {dimension_semantics = [], scalar_prefetch = 0 : i64, scratch_operands = 0 : i64, tpu.core_type = #tpu.core_type<tc>} {
    %c0 = arith.constant 0 : index
    %c0_0 = arith.constant 0 : index
    %0 = vector.load %arg0[%c0, %c0_0] : memref<8x4xf32, #tpu.memory_space<vmem>>, vector<8x4xf32>
    %c0_1 = arith.constant 0 : index
    %c0_2 = arith.constant 0 : index
    %1 = vector.load %arg1[%c0_1, %c0_2] : memref<4x8xf32, #tpu.memory_space<vmem>>, vector<4x8xf32>
    %c0_3 = arith.constant 0 : index
    %c0_4 = arith.constant 0 : index
    %2 = vector.load %arg2[%c0_3, %c0_4] : memref<1x8xf32, #tpu.memory_space<vmem>>, vector<1x8xf32>
    %c0_5 = arith.constant 0 : index
    %c0_6 = arith.constant 0 : index
    %3 = vector.load %arg3[%c0_5, %c0_6] : memref<8x3xf32, #tpu.memory_space<vmem>>, vector<8x3xf32>
    %c0_7 = arith.constant 0 : index
    %c0_8 = arith.constant 0 : index
    %4 = vector.load %arg4[%c0_7, %c0_8] : memref<1x3xf32, #tpu.memory_space<vmem>>, vector<1x3xf32>
    %5 = vector.shape_cast %2 : vector<1x8xf32> to vector<1x8xf32>
    %6 = vector.broadcast %5 : vector<1x8xf32> to vector<8x8xf32>
    %7 = vector.extract_strided_slice %0 {offsets = [0, 0], sizes = [8, 1], strides = [1, 1]} : vector<8x4xf32> to vector<8x1xf32>
    %8 = vector.extract_strided_slice %1 {offsets = [0, 0], sizes = [1, 8], strides = [1, 1]} : vector<4x8xf32> to vector<1x8xf32>
    %9 = vector.broadcast %7 : vector<8x1xf32> to vector<8x8xf32>
    %10 = vector.broadcast %8 : vector<1x8xf32> to vector<8x8xf32>
    %11 = arith.mulf %9, %10 : vector<8x8xf32>
    %12 = arith.addf %6, %11 : vector<8x8xf32>
    %13 = vector.extract_strided_slice %0 {offsets = [0, 1], sizes = [8, 1], strides = [1, 1]} : vector<8x4xf32> to vector<8x1xf32>
    %14 = vector.extract_strided_slice %1 {offsets = [1, 0], sizes = [1, 8], strides = [1, 1]} : vector<4x8xf32> to vector<1x8xf32>
    %15 = vector.broadcast %13 : vector<8x1xf32> to vector<8x8xf32>
    %16 = vector.broadcast %14 : vector<1x8xf32> to vector<8x8xf32>
    %17 = arith.mulf %15, %16 : vector<8x8xf32>
    %18 = arith.addf %12, %17 : vector<8x8xf32>
    %19 = vector.extract_strided_slice %0 {offsets = [0, 2], sizes = [8, 1], strides = [1, 1]} : vector<8x4xf32> to vector<8x1xf32>
    %20 = vector.extract_strided_slice %1 {offsets = [2, 0], sizes = [1, 8], strides = [1, 1]} : vector<4x8xf32> to vector<1x8xf32>
    %21 = vector.broadcast %19 : vector<8x1xf32> to vector<8x8xf32>
    %22 = vector.broadcast %20 : vector<1x8xf32> to vector<8x8xf32>
    %23 = arith.mulf %21, %22 : vector<8x8xf32>
    %24 = arith.addf %18, %23 : vector<8x8xf32>
    %25 = vector.extract_strided_slice %0 {offsets = [0, 3], sizes = [8, 1], strides = [1, 1]} : vector<8x4xf32> to vector<8x1xf32>
    %26 = vector.extract_strided_slice %1 {offsets = [3, 0], sizes = [1, 8], strides = [1, 1]} : vector<4x8xf32> to vector<1x8xf32>
    %27 = vector.broadcast %25 : vector<8x1xf32> to vector<8x8xf32>
    %28 = vector.broadcast %26 : vector<1x8xf32> to vector<8x8xf32>
    %29 = arith.mulf %27, %28 : vector<8x8xf32>
    %30 = arith.addf %24, %29 : vector<8x8xf32>
    %cst = arith.constant 0.000000e+00 : f32
    %31 = vector.broadcast %cst : f32 to vector<8x8xf32>
    %32 = arith.maximumf %30, %31 : vector<8x8xf32>
    %33 = vector.shape_cast %4 : vector<1x3xf32> to vector<1x3xf32>
    %34 = vector.broadcast %33 : vector<1x3xf32> to vector<8x3xf32>
    %35 = vector.extract_strided_slice %32 {offsets = [0, 0], sizes = [8, 1], strides = [1, 1]} : vector<8x8xf32> to vector<8x1xf32>
    %36 = vector.extract_strided_slice %3 {offsets = [0, 0], sizes = [1, 3], strides = [1, 1]} : vector<8x3xf32> to vector<1x3xf32>
    %37 = vector.broadcast %35 : vector<8x1xf32> to vector<8x3xf32>
    %38 = vector.broadcast %36 : vector<1x3xf32> to vector<8x3xf32>
    %39 = arith.mulf %37, %38 : vector<8x3xf32>
    %40 = arith.addf %34, %39 : vector<8x3xf32>
    %41 = vector.extract_strided_slice %32 {offsets = [0, 1], sizes = [8, 1], strides = [1, 1]} : vector<8x8xf32> to vector<8x1xf32>
    %42 = vector.extract_strided_slice %3 {offsets = [1, 0], sizes = [1, 3], strides = [1, 1]} : vector<8x3xf32> to vector<1x3xf32>
    %43 = vector.broadcast %41 : vector<8x1xf32> to vector<8x3xf32>
    %44 = vector.broadcast %42 : vector<1x3xf32> to vector<8x3xf32>
    %45 = arith.mulf %43, %44 : vector<8x3xf32>
    %46 = arith.addf %40, %45 : vector<8x3xf32>
    %47 = vector.extract_strided_slice %32 {offsets = [0, 2], sizes = [8, 1], strides = [1, 1]} : vector<8x8xf32> to vector<8x1xf32>
    %48 = vector.extract_strided_slice %3 {offsets = [2, 0], sizes = [1, 3], strides = [1, 1]} : vector<8x3xf32> to vector<1x3xf32>
    %49 = vector.broadcast %47 : vector<8x1xf32> to vector<8x3xf32>
    %50 = vector.broadcast %48 : vector<1x3xf32> to vector<8x3xf32>
    %51 = arith.mulf %49, %50 : vector<8x3xf32>
    %52 = arith.addf %46, %51 : vector<8x3xf32>
    %53 = vector.extract_strided_slice %32 {offsets = [0, 3], sizes = [8, 1], strides = [1, 1]} : vector<8x8xf32> to vector<8x1xf32>
    %54 = vector.extract_strided_slice %3 {offsets = [3, 0], sizes = [1, 3], strides = [1, 1]} : vector<8x3xf32> to vector<1x3xf32>
    %55 = vector.broadcast %53 : vector<8x1xf32> to vector<8x3xf32>
    %56 = vector.broadcast %54 : vector<1x3xf32> to vector<8x3xf32>
    %57 = arith.mulf %55, %56 : vector<8x3xf32>
    %58 = arith.addf %52, %57 : vector<8x3xf32>
    %59 = vector.extract_strided_slice %32 {offsets = [0, 4], sizes = [8, 1], strides = [1, 1]} : vector<8x8xf32> to vector<8x1xf32>
    %60 = vector.extract_strided_slice %3 {offsets = [4, 0], sizes = [1, 3], strides = [1, 1]} : vector<8x3xf32> to vector<1x3xf32>
    %61 = vector.broadcast %59 : vector<8x1xf32> to vector<8x3xf32>
    %62 = vector.broadcast %60 : vector<1x3xf32> to vector<8x3xf32>
    %63 = arith.mulf %61, %62 : vector<8x3xf32>
    %64 = arith.addf %58, %63 : vector<8x3xf32>
    %65 = vector.extract_strided_slice %32 {offsets = [0, 5], sizes = [8, 1], strides = [1, 1]} : vector<8x8xf32> to vector<8x1xf32>
    %66 = vector.extract_strided_slice %3 {offsets = [5, 0], sizes = [1, 3], strides = [1, 1]} : vector<8x3xf32> to vector<1x3xf32>
    %67 = vector.broadcast %65 : vector<8x1xf32> to vector<8x3xf32>
    %68 = vector.broadcast %66 : vector<1x3xf32> to vector<8x3xf32>
    %69 = arith.mulf %67, %68 : vector<8x3xf32>
    %70 = arith.addf %64, %69 : vector<8x3xf32>
    %71 = vector.extract_strided_slice %32 {offsets = [0, 6], sizes = [8, 1], strides = [1, 1]} : vector<8x8xf32> to vector<8x1xf32>
    %72 = vector.extract_strided_slice %3 {offsets = [6, 0], sizes = [1, 3], strides = [1, 1]} : vector<8x3xf32> to vector<1x3xf32>
    %73 = vector.broadcast %71 : vector<8x1xf32> to vector<8x3xf32>
    %74 = vector.broadcast %72 : vector<1x3xf32> to vector<8x3xf32>
    %75 = arith.mulf %73, %74 : vector<8x3xf32>
    %76 = arith.addf %70, %75 : vector<8x3xf32>
    %77 = vector.extract_strided_slice %32 {offsets = [0, 7], sizes = [8, 1], strides = [1, 1]} : vector<8x8xf32> to vector<8x1xf32>
    %78 = vector.extract_strided_slice %3 {offsets = [7, 0], sizes = [1, 3], strides = [1, 1]} : vector<8x3xf32> to vector<1x3xf32>
    %79 = vector.broadcast %77 : vector<8x1xf32> to vector<8x3xf32>
    %80 = vector.broadcast %78 : vector<1x3xf32> to vector<8x3xf32>
    %81 = arith.mulf %79, %80 : vector<8x3xf32>
    %82 = arith.addf %76, %81 : vector<8x3xf32>
    %c0_9 = arith.constant 0 : index
    %c0_10 = arith.constant 0 : index
    %83 = vector.load %arg5[%c0_9, %c0_10] : memref<8x3xf32, #tpu.memory_space<vmem>>, vector<8x3xf32>
    tpu.vector_store %arg5[%c0_9, %c0_10], %82 {strides = array<i32>} : memref<8x3xf32, #tpu.memory_space<vmem>>, vector<8x3xf32>,
    return
  }
}

</mosaic_0001>

<bundles_post_ra>
// kernel: penguin_classifier_forward.1
= control target key start
LH: loop header
LB: loop body
LE: loop exit
PB: predicated region body
PF: predicated region fallthrough
CT: control target
= control target key end

     0   :  { %v188_v0 = vmov 0   ;;  %v189_v2 = vmov 2   ;;  %v190_v3 = vmov 1   ;;  %v191_v4 = vmov 3   ;;  %s254_s0 = inlined_call_operand.vmem [shape: f32[8,4], index: 0, kind: input, shape index: {}]   ;;  %s255_s1 = inlined_call_operand.vmem [shape: f32[4,8], index: 1, kind: input, shape index: {}]   ;;  %s256_s2 = inlined_call_operand.vmem [shape: f32[1,8], index: 2, kind: input, shape index: {}]   ;;  %s257_s3 = inlined_call_operand.vmem [shape: f32[8,3], index: 3, kind: input, shape index: {}]   ;;  %s258_s4 = inlined_call_operand.vmem [shape: f32[1,3], index: 4, kind: input, shape index: {}]   ;;  %s259_s5 = inlined_call_operand.vmem [shape: f32[8,3], index: 5, kind: output, shape index: {}]  }
   0x1   :  { %176 = vset.pattern.permute.xlu0 %v188_v0  ;;  %v20_v1 = vld [vmem:[%s254_s0] sm:$0xff]  ;;  %178 = vset.pattern.permute.xlu1 %v189_v2  ;;  %v36_v5 = vlaneseq  ;;  %v192_v30 = vmov 6   ;;  %v193_v31 = vmov 4   ;;  %v194_v32 = vmov 5  }
   0x2   :  { %33 = vperm.xlu0 %176, %v20_v1   ;;  %53 = vperm.xlu1 %178, %v20_v1   ;;  %v21_v8 = vld [vmem:[%s255_s1] sm:$0xf]  ;;  %v195_v33 = vmov 7   ;;  %vm160_vm0 = vcmask 23552  }
   0x3   :  { %v229_v6 = vshrl.u32 %v36_v5, 7  ;;  %v166_v17 = vld [vmem:[%s256_s2] ss:$0 sm:$0xff] }
   0x4   :  { %v23_v34 = vld [vmem:[%s257_s3] sm:$0xff] }
   0x5   :  { %v38_v7 = vsub.s32 0, %v229_v6  ;;  %v48_v10 = vsub.s32 1, %v229_v6  ;;  %v58_v12 = vsub.s32 2, %v229_v6  ;;  %v68_v14 = vsub.s32 3, %v229_v6  ;;  %v167_v38 = vld [vmem:[%s258_s4] ss:$0 sm:$0xff] }
   0x6   :  { %177 = vset.pattern.permute.xlu0 %v190_v3  ;;  %179 = vset.pattern.permute.xlu1 %v191_v4  ;;  %v126_v44 = vsub.s32 4, %v229_v6  ;;  %v136_v52 = vsub.s32 5, %v229_v6  ;;  %v146_v54 = vsub.s32 6, %v229_v6  ;;  %v156_v59 = vsub.s32 7, %v229_v6 }
   0x7   :  { %43 = vperm.xlu0 %177, %v20_v1   ;;  %63 = vperm.xlu1 %179, %v20_v1   ;;  %v39_v9 = vrot.slane %v21_v8, %v38_v7  ;;  %v49_v16 = vrot.slane %v21_v8, %v48_v10  ;;  %v59_v18 = vrot.slane %v21_v8, %v58_v12 }
   0x8   :  { %v69_v19 = vrot.slane %v21_v8, %v68_v14  ;;  %v87_v35 = vrot.slane %v23_v34, %v38_v7  ;;  %v97_v36 = vrot.slane %v23_v34, %v48_v10  ;;  %v107_v41 = vrot.slane %v23_v34, %v58_v12 }
   0x9   :  { %v117_v47 = vrot.slane %v23_v34, %v68_v14  ;;  %v127_v51 = vrot.slane %v23_v34, %v126_v44  ;;  %v137_v58 = vrot.slane %v23_v34, %v136_v52  ;;  %v147_v60 = vrot.slane %v23_v34, %v146_v54 }
   0xa   :  { %v157_v1 = vrot.slane %v23_v34, %v156_v59 }
   0xb   :  { %180 = vset.pattern.permute.xlu1 %v188_v0 }
  0x7d   :  { %v34_v11 = vpop.permute.xlu0 %33  ;;  %v54_v13 = vpop.permute.xlu1 %53 }
  0x7e   :  { %v40_v15 = vmul.f32 %v39_v9, %v34_v11  ;;  %v60_v24 = vmul.f32 %v59_v18, %v54_v13 }
  0x80   :  { %v41_v22 = vadd.f32 %v166_v17, %v40_v15 }
  0x82   :  { %v44_v20 = vpop.permute.xlu0 %43  ;;  %v64_v21 = vpop.permute.xlu1 %63 }
  0x83   :  { %v50_v23 = vmul.f32 %v49_v16, %v44_v20  ;;  %v70_v26 = vmul.f32 %v69_v19, %v64_v21 }
  0x85   :  { %v51_v25 = vadd.f32 %v50_v23, %v41_v22 }
  0x87   :  { %v61_v27 = vadd.f32 %v60_v24, %v51_v25 }
  0x89   :  { %v71_v28 = vadd.f32 %v70_v26, %v61_v27 }
  0x8b   :  { %v72_v29 = vmax.f32 %v71_v28, 0.0 }
  0x8d   :  { %91 = vperm.xlu0 %177, %v72_v29   ;;  %81 = vperm.xlu1 %180, %v72_v29  }
  0x91   :  { %182 = vset.pattern.permute.xlu0 %v191_v4  ;;  %181 = vset.pattern.permute.xlu1 %v189_v2 }
  0x92   :  { %111 = vperm.xlu0 %182, %v72_v29   ;;  %101 = vperm.xlu1 %181, %v72_v29  }
  0x96   :  { %185 = vset.pattern.permute.xlu0 %v192_v30  ;;  %183 = vset.pattern.permute.xlu1 %v193_v31 }
  0x97   :  { %141 = vperm.xlu0 %185, %v72_v29   ;;  %121 = vperm.xlu1 %183, %v72_v29  }
  0x9b   :  { %184 = vset.pattern.permute.xlu1 %v194_v32  ;;  %187 = vset.pattern.permute.xlu0 %v195_v33 }
  0x9c   :  { %131 = vperm.xlu1 %184, %v72_v29  }
  0xa0   :  { %186 = vset.pattern.permute.xlu1 %v195_v33 }
  0xa1   :  { %151 = vperm.xlu1 %186, %v72_v29  }
 0x108   :  { %v92_v37 = vpop.permute.xlu0 %91  ;;  %v82_v39 = vpop.permute.xlu1 %81 }
 0x109   :  { %v88_v40 = vmul.f32 %v87_v35, %v82_v39  ;;  %v98_v42 = vmul.f32 %v97_v36, %v92_v37 }
 0x10b   :  { %v89_v43 = vadd.f32 %v167_v38, %v88_v40 }
 0x10d   :  { %v99_v45 = vadd.f32 %v98_v42, %v89_v43  ;;  %v102_v46 = vpop.permute.xlu1 %101  ;;  %v112_v49 = vpop.permute.xlu0 %111 }
 0x10e   :  { %v108_v48 = vmul.f32 %v107_v41, %v102_v46  ;;  %v118_v53 = vmul.f32 %v117_v47, %v112_v49 }
 0x110   :  { %v109_v50 = vadd.f32 %v108_v48, %v99_v45 }
 0x112   :  { %v122_v55 = vpop.permute.xlu1 %121  ;;  %v119_v56 = vadd.f32 %v118_v53, %v109_v50  ;;  %v142_v61 = vpop.permute.xlu0 %141 }
 0x113   :  { %v128_v57 = vmul.f32 %v127_v51, %v122_v55  ;;  %v148_v2 = vmul.f32 %v147_v60, %v142_v61 }
 0x115   :  { %v129_v63 = vadd.f32 %v128_v57, %v119_v56 }
 0x117   :  { %v132_v62 = vpop.permute.xlu1 %131 }
 0x118   :  { %v138_v0 = vmul.f32 %v137_v58, %v132_v62 }
 0x11a   :  { %v139_v3 = vadd.f32 %v138_v0, %v129_v63 }
 0x11c   :  { %v149_v4 = vadd.f32 %v148_v2, %v139_v3  ;;  %v152_v5 = vpop.permute.xlu1 %151 }
 0x11d   :  { %v158_v7 = vmul.f32 %v157_v1, %v152_v5 }
 0x11f   :  { %v159_v8 = vadd.f32 %v158_v7, %v149_v4 }
 0x121   :  { %161 = vst.msk [vmem:[%s259_s5] sm:$0xff] %vm160_vm0, %v159_v8 }

</bundles_post_ra>
